<compile_context>
chip_gen: v5e
topology: v5e:2x2
jax: 0.10.0
libtpu: 0.0.40
codegen_flags: <defaults>
</compile_context>

<pallas_src>
import functools

import jax
import jax.numpy as jnp
from jax.experimental import pallas as pl
from jax.experimental.pallas import tpu as pltpu

LANES = 128          # TPU lane width; every feature dim is padded to this
HID1, HID2 = 64, 128 # fc1 / fc2 widths from the PyTorch module


def _round_up(n, m):
    return ((n + m - 1) // m) * m


def dqn_kernel(x_ref, w_ref, b_ref, o_ref):
    """Fused fc1 -> ReLU -> fc2 -> ReLU -> critic on one (TB, 128) batch tile.

    x_ref: (TB, 128)      f32   lane-padded input tile (streamed per grid step)
    w_ref: (3, 128, 128)  bf16  lane-padded weights, VMEM-resident across grid
    b_ref: (3, 128)       f32   lane-padded biases, VMEM-resident across grid
    o_ref: (TB, 128)      f32   lane-padded output tile (cols >= num_actions are 0)
    """
    b = b_ref[...]                                   # tiny, load once
    x = x_ref[...].astype(jnp.bfloat16)

    # Layer 1: bf16 matmul on MXU, f32 accumulate, f32 bias + ReLU.
    h1 = jnp.dot(x, w_ref[0], preferred_element_type=jnp.float32) + b[0:1, :]
    h1 = jnp.maximum(h1, 0.0)

    # Layer 2
    h2 = jnp.dot(h1.astype(jnp.bfloat16), w_ref[1],
                 preferred_element_type=jnp.float32) + b[1:2, :]
    h2 = jnp.maximum(h2, 0.0)

    # Critic head (lane-dense 128-wide store; real outputs live in the first A lanes).
    out = jnp.dot(h2.astype(jnp.bfloat16), w_ref[2],
                  preferred_element_type=jnp.float32) + b[2:3, :]
    o_ref[...] = out.astype(o_ref.dtype)


def pack_params(params, num_actions):
    """Zero-pad every weight/bias to 128 lanes and pack into two buffers.

    Returns:
      W: (3, 128, 128) bf16  -- [fc1 | fc2 | critic] in x @ W layout
      B: (3, 128)      f32   -- matching biases
    Zero padding is exact: padded input lanes hit zero weight rows, padded hidden
    lanes carry zero bias through ReLU, padded output lanes stay zero.
    """
    w1, b1, w2, b2, w3, b3 = params
    A = num_actions
    W = jnp.zeros((3, LANES, LANES), jnp.bfloat16)
    W = W.at[0, :A, :HID1].set(w1.astype(jnp.bfloat16))
    W = W.at[1, :HID1, :HID2].set(w2.astype(jnp.bfloat16))
    W = W.at[2, :HID2, :A].set(w3.astype(jnp.bfloat16))
    Bv = jnp.zeros((3, LANES), jnp.float32)
    Bv = Bv.at[0, :HID1].set(b1.reshape(-1).astype(jnp.float32))
    Bv = Bv.at[1, :HID2].set(b2.reshape(-1).astype(jnp.float32))
    Bv = Bv.at[2, :A].set(b3.reshape(-1).astype(jnp.float32))
    return W, Bv


@functools.partial(jax.jit, static_argnames=("block_b",))
def dqn_forward(x, params, *, block_b=256):
    """x: [B, num_actions] float32. Returns [B, num_actions] float32."""
    B, A = x.shape
    # Batch tile: multiple of 8 sublanes, at most block_b rows.
    tb = min(block_b, _round_up(B, 8))
    bp = _round_up(B, tb)

    # Lane-pad input to 128 and batch-pad up to the tile grid.
    x_pad = jnp.zeros((bp, LANES), jnp.float32).at[:B, :A].set(
        x.astype(jnp.float32))
    W, Bv = pack_params(params, A)

    out_pad = pl.pallas_call(
        dqn_kernel,
        out_shape=jax.ShapeDtypeStruct((bp, LANES), jnp.float32),
        grid=(bp // tb,),
        in_specs=[
            pl.BlockSpec((tb, LANES), lambda i: (i, 0)),           # x: streamed
            pl.BlockSpec((3, LANES, LANES), lambda i: (0, 0, 0)),  # weights: resident
            pl.BlockSpec((3, LANES), lambda i: (0, 0)),            # biases: resident
        ],
        out_specs=pl.BlockSpec((tb, LANES), lambda i: (i, 0)),
        compiler_params=pltpu.CompilerParams(
            dimension_semantics=("parallel",)),  # v7x: shard batch tiles over both TCs
    )(x_pad, W, Bv)

    return out_pad[:B, :A]


def init_params(key, num_actions):
    # Deterministic synthetic init (PyTorch uses orthogonal init + zero bias;
    # scaled-normal stand-in keeps the forward semantics identical).
    k1, k2, k3 = jax.random.split(key, 3)
    std = jnp.sqrt(2.0)
    w1 = std * jax.random.normal(k1, (num_actions, HID1), jnp.float32) / jnp.sqrt(1.0 * num_actions)
    b1 = jnp.zeros((HID1,), jnp.float32)
    w2 = std * jax.random.normal(k2, (HID1, HID2), jnp.float32) / jnp.sqrt(1.0 * HID1)
    b2 = jnp.zeros((HID2,), jnp.float32)
    w3 = std * jax.random.normal(k3, (HID2, num_actions), jnp.float32) / jnp.sqrt(1.0 * HID2)
    b3 = jnp.zeros((num_actions,), jnp.float32)
    return (w1, b1, w2, b2, w3, b3)


if __name__ == "__main__":
    num_actions = 4
    key = jax.random.PRNGKey(0)
    kx, kp = jax.random.split(key)
    params = init_params(kp, num_actions)
    w1, b1, w2, b2, w3, b3 = params

    def ref_fp32(xx):  # original PyTorch (f32) semantics
        h1 = jnp.maximum(xx @ w1 + b1, 0.0)
        h2 = jnp.maximum(h1 @ w2 + b2, 0.0)
        return h2 @ w3 + b3

    def ref_bf16(xx):  # same-math reference (bf16 operands, f32 accumulate)
        bf = jnp.bfloat16
        h1 = jnp.maximum(jnp.dot(xx.astype(bf), w1.astype(bf),
                                 preferred_element_type=jnp.float32) + b1, 0.0)
        h2 = jnp.maximum(jnp.dot(h1.astype(bf), w2.astype(bf),
                                 preferred_element_type=jnp.float32) + b2, 0.0)
        return jnp.dot(h2.astype(bf), w3.astype(bf),
                       preferred_element_type=jnp.float32) + b3

    # Exercise both the single-tile path (B=8) and the multi-tile streamed path (B=512).
    for batch in (8, 512):
        x = jax.random.normal(jax.random.fold_in(kx, batch),
                              (batch, num_actions), jnp.float32)
        out = jax.block_until_ready(dqn_forward(x, params))
        assert out.shape == (batch, num_actions)
        # Tight check against the bf16-weight reference (same math as the kernel).
        assert jnp.allclose(out, ref_bf16(x), atol=1e-2, rtol=1e-2)
        # Loose check against the full-f32 PyTorch-semantics reference.
        assert jnp.allclose(out, ref_fp32(x), atol=1e-1, rtol=1e-1)

    print("KERNEL_OK")
</pallas_src>

<mosaic_0001>
module attributes {stable_mosaic.version = 11 : i64} {
  func.func @dqn_kernel(%arg0: i32, %arg1: memref<8x128xf32, #tpu.memory_space<vmem>>, %arg2: memref<3x128x128xbf16, #tpu.memory_space<vmem>>, %arg3: memref<3x128xf32, #tpu.memory_space<vmem>>, %arg4: memref<8x128xf32, #tpu.memory_space<vmem>>) attributes {dimension_semantics = [#tpu.dimension_semantics<parallel>], iteration_bounds = array<i64: 1>, scalar_prefetch = 0 : i64, scratch_operands = 0 : i64, tpu.core_type = #tpu.core_type<tc>, window_params = [{transform_indices = @transform_0, window_bounds = array<i64: 8, 128>}, {pipeline_mode = #tpu.pipeline_mode<synchronous>, transform_indices = @transform_1, window_bounds = array<i64: 3, 128, 128>}, {pipeline_mode = #tpu.pipeline_mode<synchronous>, transform_indices = @transform_2, window_bounds = array<i64: 3, 128>}, {transform_indices = @transform_3, window_bounds = array<i64: 8, 128>}]} {
    %c0 = arith.constant 0 : index
    %c0_0 = arith.constant 0 : index
    %0 = vector.load %arg3[%c0, %c0_0] : memref<3x128xf32, #tpu.memory_space<vmem>>, vector<3x128xf32>
    %c0_1 = arith.constant 0 : index
    %c0_2 = arith.constant 0 : index
    %1 = vector.load %arg1[%c0_1, %c0_2] : memref<8x128xf32, #tpu.memory_space<vmem>>, vector<8x128xf32>
    %2 = arith.truncf %1 : vector<8x128xf32> to vector<8x128xbf16>
    %c0_3 = arith.constant 0 : index
    %c0_4 = arith.constant 0 : index
    %c0_5 = arith.constant 0 : index
    %3 = vector.load %arg2[%c0_3, %c0_4, %c0_5] : memref<3x128x128xbf16, #tpu.memory_space<vmem>>, vector<1x128x128xbf16>
    %4 = vector.shape_cast %3 : vector<1x128x128xbf16> to vector<128x128xbf16>
    %cst = arith.constant dense<0.000000e+00> : vector<8x128xf32>
    %5 = tpu.matmul %2, %4, %cst {dimension_numbers = #tpu.dot_dimension_numbers<[1], [0], [0], [1], [0, 0, 1, 1], [], []>} : vector<8x128xbf16>, vector<128x128xbf16>, vector<8x128xf32> -> vector<8x128xf32>
    %6 = vector.extract_strided_slice %0 {offsets = [0, 0], sizes = [1, 128], strides = [1, 1]} : vector<3x128xf32> to vector<1x128xf32>
    %7 = vector.broadcast %6 : vector<1x128xf32> to vector<8x128xf32>
    %8 = arith.addf %5, %7 : vector<8x128xf32>
    %cst_6 = arith.constant 0.000000e+00 : f32
    %9 = vector.broadcast %cst_6 : f32 to vector<8x128xf32>
    %10 = arith.maximumf %8, %9 : vector<8x128xf32>
    %11 = arith.truncf %10 : vector<8x128xf32> to vector<8x128xbf16>
    %c1 = arith.constant 1 : index
    %c0_7 = arith.constant 0 : index
    %c0_8 = arith.constant 0 : index
    %12 = vector.load %arg2[%c1, %c0_7, %c0_8] : memref<3x128x128xbf16, #tpu.memory_space<vmem>>, vector<1x128x128xbf16>
    %13 = vector.shape_cast %12 : vector<1x128x128xbf16> to vector<128x128xbf16>
    %cst_9 = arith.constant dense<0.000000e+00> : vector<8x128xf32>
    %14 = tpu.matmul %11, %13, %cst_9 {dimension_numbers = #tpu.dot_dimension_numbers<[1], [0], [0], [1], [0, 0, 1, 1], [], []>} : vector<8x128xbf16>, vector<128x128xbf16>, vector<8x128xf32> -> vector<8x128xf32>
    %15 = vector.extract_strided_slice %0 {offsets = [1, 0], sizes = [1, 128], strides = [1, 1]} : vector<3x128xf32> to vector<1x128xf32>
    %16 = vector.broadcast %15 : vector<1x128xf32> to vector<8x128xf32>
    %17 = arith.addf %14, %16 : vector<8x128xf32>
    %cst_10 = arith.constant 0.000000e+00 : f32
    %18 = vector.broadcast %cst_10 : f32 to vector<8x128xf32>
    %19 = arith.maximumf %17, %18 : vector<8x128xf32>
    %20 = arith.truncf %19 : vector<8x128xf32> to vector<8x128xbf16>
    %c2 = arith.constant 2 : index
    %c0_11 = arith.constant 0 : index
    %c0_12 = arith.constant 0 : index
    %21 = vector.load %arg2[%c2, %c0_11, %c0_12] : memref<3x128x128xbf16, #tpu.memory_space<vmem>>, vector<1x128x128xbf16>
    %22 = vector.shape_cast %21 : vector<1x128x128xbf16> to vector<128x128xbf16>
    %cst_13 = arith.constant dense<0.000000e+00> : vector<8x128xf32>
    %23 = tpu.matmul %20, %22, %cst_13 {dimension_numbers = #tpu.dot_dimension_numbers<[1], [0], [0], [1], [0, 0, 1, 1], [], []>} : vector<8x128xbf16>, vector<128x128xbf16>, vector<8x128xf32> -> vector<8x128xf32>
    %24 = vector.extract_strided_slice %0 {offsets = [2, 0], sizes = [1, 128], strides = [1, 1]} : vector<3x128xf32> to vector<1x128xf32>
    %25 = vector.broadcast %24 : vector<1x128xf32> to vector<8x128xf32>
    %26 = arith.addf %23, %25 : vector<8x128xf32>
    %c0_14 = arith.constant 0 : index
    %c0_15 = arith.constant 0 : index
    %27 = vector.load %arg4[%c0_14, %c0_15] : memref<8x128xf32, #tpu.memory_space<vmem>>, vector<8x128xf32>
    tpu.vector_store %arg4[%c0_14, %c0_15], %26 {strides = array<i32>} : memref<8x128xf32, #tpu.memory_space<vmem>>, vector<8x128xf32>,
    return
  }
  func.func @transform_0(%arg0: i32) -> (i32, i32) {
    %c0_i32 = arith.constant 0 : i32
    %c0_i32_0 = arith.constant 0 : i32
    return %arg0, %c0_i32 : i32, i32
  }
  func.func @transform_1(%arg0: i32) -> (i32, i32, i32) {
    %c0_i32 = arith.constant 0 : i32
    %c0_i32_0 = arith.constant 0 : i32
    %c0_i32_1 = arith.constant 0 : i32
    %c0_i32_2 = arith.constant 0 : i32
    return %c0_i32, %c0_i32_0, %c0_i32_1 : i32, i32, i32
  }
  func.func @transform_2(%arg0: i32) -> (i32, i32) {
    %c0_i32 = arith.constant 0 : i32
    %c0_i32_0 = arith.constant 0 : i32
    %c0_i32_1 = arith.constant 0 : i32
    return %c0_i32, %c0_i32_0 : i32, i32
  }
  func.func @transform_3(%arg0: i32) -> (i32, i32) {
    %c0_i32 = arith.constant 0 : i32
    %c0_i32_0 = arith.constant 0 : i32
    return %arg0, %c0_i32 : i32, i32
  }
}

</mosaic_0001>

<bundles_post_ra>
// kernel: dqn_forward.1
= control target key start
LH: loop header
LB: loop body
LE: loop exit
PB: predicated region body
PF: predicated region fallthrough
CT: control target
= control target key end

     0   :  { %s515_s1 = inlined_call_operand.vmem [shape: bf16[3,128,128], index: 1, kind: input, shape index: {}]   ;;  %s516_s0 = inlined_call_operand.vmem [shape: f32[8,128], index: 0, kind: input, shape index: {}]   ;;  %s517_s2 = inlined_call_operand.vmem [shape: f32[3,128], index: 2, kind: input, shape index: {}]   ;;  %s518_s3 = inlined_call_operand.vmem [shape: f32[8,128], index: 3, kind: output, shape index: {}]  }
   0x1   :  { %v397_v0 = vld [vmem:[%s515_s1 + $0x38] sm:$0xff]  ;;  %v396_v1 = vld [vmem:[%s515_s1 + $0x30] sm:$0xff]  ;;  %v395_v4 = vld [vmem:[%s515_s1 + $0x28] sm:$0xff] }
   0x2   :  { %82 = vmatpush.bf16.msra.mxu0 %v397_v0  ;;  %v405_v2 = vld [vmem:[%s515_s1 + $0x78] sm:$0xff]  ;;  %v404_v3 = vld [vmem:[%s515_s1 + $0x70] sm:$0xff]  ;;  %v403_v5 = vld [vmem:[%s515_s1 + $0x68] sm:$0xff] }
   0x3   :  { %163 = vmatpush.bf16.msra.mxu1 %v405_v2  ;;  %v394_v6 = vld [vmem:[%s515_s1 + $0x20] sm:$0xff]  ;;  %v393_v8 = vld [vmem:[%s515_s1 + $0x18] sm:$0xff]  ;;  %v392_v10 = vld [vmem:[%s515_s1 + $0x10] sm:$0xff] }
   0x4   :  { %v402_v7 = vld [vmem:[%s515_s1 + $0x60] sm:$0xff]  ;;  %v401_v9 = vld [vmem:[%s515_s1 + $0x58] sm:$0xff]  ;;  %v400_v11 = vld [vmem:[%s515_s1 + $0x50] sm:$0xff] }
   0x5   :  { %v391_v12 = vld [vmem:[%s515_s1 + $0x8] sm:$0xff]  ;;  %v390_v13 = vld [vmem:[%s515_s1] sm:$0xff]  ;;  %v413_v18 = vld [vmem:[%s515_s1 + $0xb8] sm:$0xff] }
   0x6   :  { %83 = vmatpush.bf16.msra.mxu0 %v396_v1  ;;  %v15_v14 = vld [vmem:[%s516_s0] sm:$0xff]  ;;  %v399_v16 = vld [vmem:[%s515_s1 + $0x48] sm:$0xff]  ;;  %244 = vmatpush.bf16.msra.mxu2 %v413_v18  ;;  %v412_v19 = vld [vmem:[%s515_s1 + $0xb0] sm:$0xff] }
   0x7   :  { %164 = vmatpush.bf16.msra.mxu1 %v404_v3  ;;  %v16_v15 = vpack.c.bf16 %v15_v14, %v15_v14  ;;  %v398_v17 = vld [vmem:[%s515_s1 + $0x40] sm:$0xff]  ;;  %v411_v20 = vld [vmem:[%s515_s1 + $0xa8] sm:$0xff]  ;;  %v409_v22 = vld [vmem:[%s515_s1 + $0x98] sm:$0xff] }
   0x8   :  { %v410_v21 = vld [vmem:[%s515_s1 + $0xa0] sm:$0xff]  ;;  %v408_v24 = vld [vmem:[%s515_s1 + $0x90] sm:$0xff]  ;;  %v407_v31 = vld [vmem:[%s515_s1 + $0x88] sm:$0xff] }
   0x9   :  { %v14_v23 = vld [vmem:[%s517_s2] sm:$0x7] }
   0xa   :  { %84 = vmatpush.bf16.msra.mxu0 %v395_v4  ;;  %245 = vmatpush.bf16.msra.mxu2 %v412_v19  ;;  %v33_v25 = vperm.slane %v14_v23, 0  ;;  %v406_v32 = vld [vmem:[%s515_s1 + $0x80] sm:$0xff]  ;;  %v114_v33 = vperm.slane %v14_v23, 1  ;;  %v195_v39 = vperm.slane %v14_v23, 2 }
   0xb   :  { %165 = vmatpush.bf16.msra.mxu1 %v403_v5 }
   0xe   :  { %85 = vmatpush.bf16.msra.mxu0 %v394_v6  ;;  %246 = vmatpush.bf16.msra.mxu2 %v411_v20 }
   0xf   :  { %166 = vmatpush.bf16.msra.mxu1 %v402_v7 }
  0x12   :  { %86 = vmatpush.bf16.msra.mxu0 %v393_v8  ;;  %247 = vmatpush.bf16.msra.mxu2 %v410_v21 }
  0x13   :  { %167 = vmatpush.bf16.msra.mxu1 %v401_v9 }
  0x16   :  { %87 = vmatpush.bf16.msra.mxu0 %v392_v10  ;;  %248 = vmatpush.bf16.msra.mxu2 %v409_v22 }
  0x17   :  { %168 = vmatpush.bf16.msra.mxu1 %v400_v11 }
  0x1a   :  { %88 = vmatpush.bf16.msra.mxu0 %v391_v12  ;;  %249 = vmatpush.bf16.msra.mxu2 %v408_v24 }
  0x1b   :  { %169 = vmatpush.bf16.msra.mxu1 %v399_v16 }
  0x1e   :  { %89 = vmatpush.bf16.msra.mxu0 %v390_v13  ;;  %250 = vmatpush.bf16.msra.mxu2 %v407_v31 }
  0x1f   :  { %170 = vmatpush.bf16.msra.mxu1 %v398_v17 }
  0x21   :  { %90 = vmatmul.bf16.vlgmr.msra.gmra.mxu0 %v16_v15 }
  0x22   :  { %251 = vmatpush.bf16.msra.mxu2 %v406_v32 }
  0x9e   :  { %v91_v26 = vpop.f32.mrf.mxu0 }
  0x9f   :  { %v92_v27 = vadd.f32 %v91_v26, %v33_v25 }
  0xa1   :  { %v95_v28 = vmax.f32 %v92_v27, 0.0 }
  0xa3   :  { %v96_v29 = vpack.c.bf16 %v95_v28, %v95_v28 }
  0xa5   :  { %171 = vmatmul.bf16.vlgmr.msra.gmra.mxu1 %v96_v29 }
  0xa6   :  { %v93_v30 = vpop.f32.mrf.mxu0 }
 0x122   :  { %v172_v34 = vpop.f32.mrf.mxu1 }
 0x123   :  { %v173_v35 = vadd.f32 %v172_v34, %v114_v33 }
 0x125   :  { %v176_v36 = vmax.f32 %v173_v35, 0.0 }
 0x127   :  { %v177_v37 = vpack.c.bf16 %v176_v36, %v176_v36 }
 0x129   :  { %252 = vmatmul.bf16.vlgmr.msra.gmra.mxu2 %v177_v37 }
 0x12a   :  { %v174_v38 = vpop.f32.mrf.mxu1 }
 0x1ac   :  { %v253_v40 = vpop.f32.mrf.mxu2 }
 0x1ad   :  { %v254_v41 = vadd.f32 %v253_v40, %v195_v39 }
 0x1af   :  { %257 = vst [vmem:[%s518_s3] sm:$0xff] %v254_v41 }
 0x1b4   :  { %v255_v42 = vpop.f32.mrf.mxu2 }

</bundles_post_ra>
